<compile_context>
chip_gen: v6e
topology: v6e:2x2x1
jax: 0.10.0
libtpu: 0.0.40
codegen_flags: <defaults>
</compile_context>

<pallas_src>
import jax
import jax.numpy as jnp
from jax import lax
from jax.experimental import pallas as pl
from jax.experimental.pallas import tpu as pltpu


_DEF_ROWS_PER_STEP = 128          # row-block size; one grid step for typical B
_GATHER_SEM_POOL = 8              # round-robin DMA semaphore pool (HBM path)


def _vmem_capacity_bytes():
    """Per-core physical VMEM (generation aware), conservative fallback."""
    try:
        cap = getattr(pltpu.get_tpu_info(), "vmem_capacity_bytes", None)
        if cap:
            return int(cap)
    except Exception:
        pass
    return 64 << 20   # v7x per-TensorCore physical VMEM (smallest of v5e/v6e/v7x)


# ---------------------------------------------------------------------------
# Path A: table resident in VMEM; gather = one_hot(ids) @ table on the MXU.
# ---------------------------------------------------------------------------
def _resident_gather_kernel(ids_ref, table_ref, out_ref):
    """ids_ref: VMEM i32 [rows,1]; table_ref: VMEM [n_classes,D] (resident);
    out_ref: VMEM [rows,D]."""
    rows = out_ref.shape[0]
    n_classes = table_ref.shape[0]
    col = lax.broadcasted_iota(jnp.int32, (rows, n_classes), 1)
    onehot = (col == ids_ref[...]).astype(table_ref.dtype)          # (rows, n_classes)
    out_ref[...] = jnp.dot(onehot, table_ref[...],
                           preferred_element_type=jnp.float32).astype(out_ref.dtype)


def _resident_pallas(eff_ids, table, rows):
    B = eff_ids.shape[0]
    n_classes, D = table.shape
    grid = pl.cdiv(B, rows)
    vmem_cap = _vmem_capacity_bytes()
    return pl.pallas_call(
        _resident_gather_kernel,
        out_shape=jax.ShapeDtypeStruct((B, D), table.dtype),
        grid_spec=pltpu.PrefetchScalarGridSpec(
            num_scalar_prefetch=0,
            grid=(grid,),
            in_specs=[
                pl.BlockSpec((rows, 1), lambda i: (i, 0)),
                # Same block index every step -> table DMA'd once, stays resident.
                pl.BlockSpec((n_classes, D), lambda i: (0, 0)),
            ],
            out_specs=pl.BlockSpec((rows, D), lambda i: (i, 0)),
        ),
        compiler_params=pltpu.CompilerParams(
            dimension_semantics=("parallel",) if grid > 1 else ("arbitrary",),
            vmem_limit_bytes=int(vmem_cap // 2),
        ),
    )(eff_ids.reshape(B, 1), table)


# ---------------------------------------------------------------------------
# Path B: table in HBM; per-row DMA straight into the pipelined output block.
# ---------------------------------------------------------------------------
def _hbm_gather_kernel(eff_ids_ref, table_hbm, out_ref, copy_sems):
    """eff_ids_ref: SMEM i32 [B] (scalar prefetch); table_hbm: HBM [n_classes,D]
    (pl.ANY, never copied whole); out_ref: VMEM [rows,D]; copy_sems: DMA sems."""
    rows = out_ref.shape[0]
    num_ids = eff_ids_ref.shape[0]
    nsems = copy_sems.shape[0]
    base = pl.program_id(0) * rows

    def row_copy(r):
        return pltpu.make_async_copy(
            table_hbm.at[eff_ids_ref[base + r]],     # (D,) row gather from HBM
            out_ref.at[r],                           # straight into the output block
            copy_sems.at[r % nsems])                 # round-robin semaphore pool

    # Issue all in-bounds row gathers first (many descriptors in flight), then
    # wait for all of them before the body ends so the pipelined output
    # writeback never races the gathers.  Ragged rows of the last block are
    # skipped via pl.when (never duplicated); Pallas clips their writeback.
    @pl.loop(0, rows)
    def _issue(r):
        @pl.when(base + r < num_ids)
        def _():
            row_copy(r).start()

    @pl.loop(0, rows)
    def _wait(r):
        @pl.when(base + r < num_ids)
        def _():
            row_copy(r).wait()
    # TODO(synk): if calls with many grid steps become common, double-buffer the
    # gathers across steps (issue step i+1's DMAs before waiting on step i's).


def _hbm_gather_pallas(eff_ids, table, rows):
    B = eff_ids.shape[0]
    n_classes, D = table.shape
    grid = pl.cdiv(B, rows)
    nsems = min(rows, _GATHER_SEM_POOL)
    return pl.pallas_call(
        _hbm_gather_kernel,
        out_shape=jax.ShapeDtypeStruct((B, D), table.dtype),
        grid_spec=pltpu.PrefetchScalarGridSpec(
            num_scalar_prefetch=1,                         # eff_ids -> SMEM
            grid=(grid,),
            in_specs=[pl.BlockSpec(memory_space=pl.ANY)],  # table stays in HBM
            out_specs=pl.BlockSpec((rows, D), lambda i, ids: (i, 0)),
            scratch_shapes=[pltpu.SemaphoreType.DMA((nsems,))],
        ),
        compiler_params=pltpu.CompilerParams(
            dimension_semantics=("parallel",) if grid > 1 else ("arbitrary",)),
    )(eff_ids, table)


def class_embedder_pallas(ids, drop, table, *, rows_per_step=_DEF_ROWS_PER_STEP,
                          force_path=None):
    """ids: i32 [B]; drop: i32 [B] (1 -> unconditional class);
    table: [n_classes, D] with D a multiple of 128.  Returns [B, 1, D]."""
    B = ids.shape[0]
    n_classes, D = table.shape
    itemsize = jnp.dtype(table.dtype).itemsize

    # Classifier-free-guidance class replacement: O(B) scalar work in the
    # wrapper so the kernels are pure gathers.
    eff_ids = jnp.where(drop != 0, n_classes - 1, ids).astype(jnp.int32)

    rows = min(B, rows_per_step)
    table_bytes = n_classes * D * itemsize
    out_block_bytes = rows * D * itemsize

    if force_path == "resident":
        use_resident = True
    elif force_path == "hbm":
        use_resident = False
    else:
        # Resident-table fast path only when table + pipelined blocks (plus the
        # one-hot scratch, bounded by table_bytes) fit comfortably in VMEM on
        # this generation (v7x: 64 MiB physical, v5e/v6e: 128 MiB).
        use_resident = (table_bytes + 4 * out_block_bytes
                        <= _vmem_capacity_bytes() // 6)

    out = (_resident_pallas(eff_ids, table, rows) if use_resident
           else _hbm_gather_pallas(eff_ids, table, rows))
    return out[:, None, :]                                   # (B, 1, D)


class ClassEmbedder:
    """JAX/Pallas port of the latent-diffusion ClassEmbedder."""

    def __init__(self, embed_dim, n_classes=1000, key='class', ucg_rate=0.1):
        self.key = key
        self.n_classes = n_classes
        self.embed_dim = embed_dim
        self.ucg_rate = ucg_rate
        # nn.Embedding default init: N(0, 1).
        table = jax.random.normal(jax.random.PRNGKey(42), (n_classes, embed_dim),
                                  dtype=jnp.float32)
        # Pad the last dim to a multiple of 128 so row DMAs / output stores are
        # lane-dense; forward() slices the pad back off.
        # TODO(synk): store the table in bfloat16 (halves DMA bytes, use 16-row
        # multiples) once the downstream consumer accepts it; f32 kept for parity.
        pad = (-embed_dim) % 128
        self.table = jnp.pad(table, ((0, 0), (0, pad))) if pad else table

    def __call__(self, batch, rng, key=None, disable_dropout=False,
                 force_path=None, rows_per_step=_DEF_ROWS_PER_STEP):
        if key is None:
            key = self.key
        c = batch[key].astype(jnp.int32)                      # (B,)
        if self.ucg_rate > 0.0 and not disable_dropout:
            # bernoulli(ucg_rate)==1 <=> torch mask==0 <=> use unconditional class.
            drop = jax.random.bernoulli(rng, self.ucg_rate, c.shape).astype(jnp.int32)
        else:
            drop = jnp.zeros(c.shape, jnp.int32)
        out = class_embedder_pallas(c, drop, self.table,
                                    rows_per_step=rows_per_step,
                                    force_path=force_path)
        return out[..., :self.embed_dim]                      # (B, 1, embed_dim)

    def get_unconditional_conditioning(self, bs):
        uc = jnp.full((bs,), self.n_classes - 1, dtype=jnp.int32)
        return {self.key: uc}


if __name__ == "__main__":
    B, n_classes, embed_dim = 8, 16, 128
    root = jax.random.PRNGKey(0)
    k_ids, k_drop = jax.random.split(root)

    embedder = ClassEmbedder(embed_dim=embed_dim, n_classes=n_classes,
                             key='class', ucg_rate=0.5)
    class_ids = jax.random.randint(k_ids, (B,), 0, n_classes, dtype=jnp.int32)
    batch = {'class': class_ids}
    ref_lookup = embedder.table[class_ids, :embed_dim][:, None, :]

    # 1) dropout disabled, auto-selected (resident) path == plain lookup.
    out_res = jax.block_until_ready(embedder(batch, k_drop, disable_dropout=True))
    assert out_res.shape == (B, 1, embed_dim)
    assert jnp.allclose(out_res, ref_lookup), "resident path mismatch"

    # 2) forced HBM per-row-DMA gather path must match too.
    out_hbm = jax.block_until_ready(
        embedder(batch, k_drop, disable_dropout=True, force_path="hbm"))
    assert jnp.allclose(out_hbm, ref_lookup), "HBM gather path mismatch"

    # 3) UCG dropout: reproduce the exact bernoulli mask with the same rng.
    drop_ref = jax.random.bernoulli(k_drop, embedder.ucg_rate, (B,)).astype(jnp.int32)
    eff_ref = jnp.where(drop_ref != 0, n_classes - 1, class_ids)
    expected_drop = embedder.table[eff_ref, :embed_dim][:, None, :]
    out_drop = jax.block_until_ready(embedder(batch, k_drop, disable_dropout=False))
    assert jnp.allclose(out_drop, expected_drop), "UCG drop path mismatch"

    # 4) ragged B (row block does not divide B): B=12, rows_per_step=8, both paths.
    ids12 = jax.random.randint(jax.random.PRNGKey(3), (12,), 0, n_classes, jnp.int32)
    ref12 = embedder.table[ids12, :embed_dim][:, None, :]
    for path in ("resident", "hbm"):
        out12 = jax.block_until_ready(
            embedder({'class': ids12}, k_drop, disable_dropout=True,
                     force_path=path, rows_per_step=8))
        assert out12.shape == (12, 1, embed_dim)
        assert jnp.allclose(out12, ref12), f"ragged-B mismatch ({path})"

    # 5) unconditional conditioning helper round-trips through the kernel.
    uc_batch = embedder.get_unconditional_conditioning(B)
    out_uc = jax.block_until_ready(embedder(uc_batch, k_drop, disable_dropout=True))
    ref_uc = jnp.broadcast_to(
        embedder.table[n_classes - 1, :embed_dim][None, None, :], out_uc.shape)
    assert jnp.allclose(out_uc, ref_uc), "unconditional conditioning mismatch"

    print("KERNEL_OK")
</pallas_src>

<mosaic_0001>
module attributes {stable_mosaic.version = 11 : i64} {
  func.func @_resident_gather_kernel(%arg0: i32, %arg1: memref<8x1xi32, #tpu.memory_space<vmem>>, %arg2: memref<16x128xf32, #tpu.memory_space<vmem>>, %arg3: memref<8x128xf32, #tpu.memory_space<vmem>>) attributes {dimension_semantics = [#tpu.dimension_semantics<arbitrary>], iteration_bounds = array<i64: 1>, scalar_prefetch = 0 : i64, scratch_operands = 0 : i64, tpu.core_type = #tpu.core_type<tc>, window_params = [{transform_indices = @transform_0, window_bounds = array<i64: 8, 1>}, {pipeline_mode = #tpu.pipeline_mode<synchronous>, transform_indices = @transform_1, window_bounds = array<i64: 16, 128>}, {transform_indices = @transform_2, window_bounds = array<i64: 8, 128>}]} {
    %0 = tpu.iota {dimensions = array<i32: 1>} : vector<8x16xi32>
    %c0 = arith.constant 0 : index
    %c0_0 = arith.constant 0 : index
    %1 = vector.load %arg1[%c0, %c0_0] : memref<8x1xi32, #tpu.memory_space<vmem>>, vector<8x1xi32>
    %2 = vector.broadcast %1 : vector<8x1xi32> to vector<8x16xi32>
    %3 = arith.cmpi eq, %0, %2 : vector<8x16xi32>
    %4 = arith.extui %3 : vector<8x16xi1> to vector<8x16xi32>
    %5 = arith.sitofp %4 : vector<8x16xi32> to vector<8x16xf32>
    %c0_1 = arith.constant 0 : index
    %c0_2 = arith.constant 0 : index
    %6 = vector.load %arg2[%c0_1, %c0_2] : memref<16x128xf32, #tpu.memory_space<vmem>>, vector<16x128xf32>
    %cst = arith.constant dense<0.000000e+00> : vector<8x128xf32>
    %7 = tpu.matmul %5, %6, %cst {dimension_numbers = #tpu.dot_dimension_numbers<[1], [0], [0], [1], [0, 0, 1, 1], [], []>} : vector<8x16xf32>, vector<16x128xf32>, vector<8x128xf32> -> vector<8x128xf32>
    %c0_3 = arith.constant 0 : index
    %c0_4 = arith.constant 0 : index
    %8 = vector.load %arg3[%c0_3, %c0_4] : memref<8x128xf32, #tpu.memory_space<vmem>>, vector<8x128xf32>
    tpu.vector_store %arg3[%c0_3, %c0_4], %7 {strides = array<i32>} : memref<8x128xf32, #tpu.memory_space<vmem>>, vector<8x128xf32>,
    return
  }
  func.func @transform_0(%arg0: i32) -> (i32, i32) {
    %c0_i32 = arith.constant 0 : i32
    %c0_i32_0 = arith.constant 0 : i32
    return %arg0, %c0_i32 : i32, i32
  }
  func.func @transform_1(%arg0: i32) -> (i32, i32) {
    %c0_i32 = arith.constant 0 : i32
    %c0_i32_0 = arith.constant 0 : i32
    %c0_i32_1 = arith.constant 0 : i32
    return %c0_i32, %c0_i32_0 : i32, i32
  }
  func.func @transform_2(%arg0: i32) -> (i32, i32) {
    %c0_i32 = arith.constant 0 : i32
    %c0_i32_0 = arith.constant 0 : i32
    return %arg0, %c0_i32 : i32, i32
  }
}

</mosaic_0001>

<bundles_post_ra>
// kernel: tpu_custom_call.1
= control target key start
LH: loop header
LB: loop body
LE: loop exit
PB: predicated region body
PF: predicated region fallthrough
CT: control target
= control target key end

     0   :  { %7 = vsyncpa [#allocation3], 0  ;;  %s222_s0 = inlined_call_operand.vmem [shape: s32[8,1], index: 0, kind: input, shape index: {}]   ;;  %s223_s1 = inlined_call_operand.hbm [shape: f32[16,128], index: 1, kind: input, shape index: {}]   ;;  %s224_s2 = inlined_call_operand.hbm [shape: f32[8,128], index: 2, kind: output, shape index: {}]  }
   0x1   :  { %8 = vsyncpa [#allocation4], 0  ;;  %s191_s9 = smov [#allocation2]  }
   0x2   :  { %s16_s10 = sshll.u32 %s191_s9, 4  ;;  %s17_s10 = int_to_ptr.vmem [resolvable:$true] %s16_s10 }
   0x3   :  { %s155_s11 = scalar_lea.vmem %s17_s10, 256  ;;  %p160_p1 = scmp.lt.s32.totalorder %s17_s10, %s17_s10 }
   0x4   :  { %p156_p0 = scmp.ne.s32.totalorder %s17_s10, %s155_s11  ;;  %p161_p2 = scmp.lt.s32.totalorder %s155_s11, %s155_s11 }
   0x6   :  { %p162_p3 = por %p161_p2, %p160_p1 }
   0x8   :  { %p163_p4 = pnand %p162_p3, %p156_p0 }
   0xa   :  { %166 = shalt.err (!%p163_p4)
}
   0xb   :  { %s192_s12 = smov 128   ;;  %s193_s13 = smov 8  }
   0xc   :  { %22 = dma.hbm_to_vmem [thread:$0]  %s223_s1, 256, %s17_s10, [#allocation3], %s192_s12, %s192_s12, %s193_s13  }
   0xd   :  { %187 = dma.done.wait [#allocation3], 256  }
   0xe   :  { %188 = vsyncadd [#allocation3], 4294967040  ;;  %v194_v0 = vmov 0   ;;  %v195_v1 = vmov 0.0   ;;  %vm196_vm0 = vmmov 0   ;;  %v28_v2 = vld [vmem:[%s222_s0] sm:$0xff]  ;;  %v26_v5 = vlaneseq }
   0xf   :  { %146 = vset.pattern.permute.xlu0 %v194_v0  ;;  %132 = vmatprep.subr.mxu0 %v195_v1  ;;  %v36_v3 = vld [vmem:[#allocation2 + $0x8] sm:$0xff]  ;;  %v35_v4 = vld [vmem:[#allocation2] sm:$0xff]  ;;  %vm37_vm1 = vcmask 130048   ;;  %s197_s1 = smov [#allocation5]  }
  0x10   :  { %136 = vmatprep.mubr.msk.f32.mxu0 %vm196_vm0, %v195_v1  ;;  %30 = vperm.xlu0 %146, %v28_v2   ;;  %v27_v6 = vand.u32 127, %v26_v5  ;;  %s118_s18 = sshll.u32 %s197_s1, 4  ;;  %s119_s18 = int_to_ptr.vmem [resolvable:$true] %s118_s18 }
  0x11   :  { %133 = vmatpush3.msra.mxu0 %v36_v3  ;;  %s167_s0 = scalar_lea.vmem %s119_s18, 128  ;;  %p172_p6 = scmp.lt.s32.totalorder %s119_s18, %s119_s18 }
  0x12   :  { %134 = vmatprep.subr.mxu0 %v195_v1  ;;  %p168_p5 = scmp.ne.s32.totalorder %s119_s18, %s167_s0  ;;  %p173_p7 = scmp.lt.s32.totalorder %s167_s0, %s167_s0 }
  0x13   :  { %135 = vmatpush3.msra.mxu0 %v35_v4 }
  0x14   :  { %p174_p8 = por %p173_p7, %p172_p6 }
  0x16   :  { %p175_p9 = pnand %p174_p8, %p168_p5 }
  0x8b   :  { %v31_v7 = vpop.permute.xlu0 %30 }
  0x8c   :  { %vm32_vm2 = vcmp.eq.s32.totalorder %v27_v6, %v31_v7 }
  0x8d   :  { %v127_v8 = vsel %vm32_vm2, 1.0, %v195_v1 }
  0x8e   :  { %137 = vmatmul.mubr.msk.f32.vlgmr.msra.gmra.mxu0 %vm37_vm1, %v127_v8 }
 0x14e   :  { %v107_v9 = vpop.f32.mrf.mxu0 }
 0x14f   :  { %111 = vst [vmem:[#allocation5] sm:$0xff] %v107_v9 }
 0x150   :  { %v138_v10 = vpop.f32.mrf.mxu0 }
 0x151   :  { %178 = shalt.err (!%p175_p9)
}
 0x152   :  { %121 = dma.vmem_to_hbm [thread:$0]  %s119_s18, 128, %s224_s2, [#allocation4]  }
 0x153   :  { %189 = dma.done.wait [#allocation4], 128  }
 0x154   :  { %190 = vsyncadd [#allocation4], 4294967168 }
 0x155   :  { %125 = vsyncpa [#allocation3], 1 }
 0x156   :  { %126 = vsyncpa [#allocation4], 1 }

</bundles_post_ra>
